<compile_context>
chip_gen: v5e
topology: v5e:2x2
jax: 0.10.0
libtpu: 0.0.40
codegen_flags: <defaults>
</compile_context>

<pallas_src>
from functools import partial

import jax
import jax.numpy as jnp
from jax.experimental import pallas as pl
from jax.experimental.pallas import tpu as pltpu

# ---- synthetic "Config" (small, deterministic) -------------------------------
FEATURE_LEN = 32     # Config.FEATURE_LEN
ACTION_NUM = 16      # Config.ACTION_NUM
VALUE_NUM = 1        # Config.VALUE_NUM

H1 = 128             # main_mlp hidden
H2 = 256             # main_mlp output
HH = 64              # per-head hidden
HEADS_HIDDEN = 2 * HH          # fused [label_hidden | value_hidden] = 128
OUT_W = 32                     # output slab width: [prob(16) | value(1) | zeros(15)]

# Packed weight-slab layout (rows; column width padded to 256, bf16).
# All row offsets are 16-aligned so bf16 sublane tiles stay aligned.
W_COLS = 256
W1_OFF = 0
W2_OFF = W1_OFF + FEATURE_LEN          # 32
WH1_OFF = W2_OFF + H1                  # 160
WH2_OFF = WH1_OFF + H2                 # 416
W_ROWS = WH2_OFF + HEADS_HIDDEN        # 544
B_ROWS = 8                             # bias slab sublane-padded to 8 rows

TM_MAX = 1024                          # max batch-tile rows (VMEM use ~3 MiB at 1024)


def network_kernel(feature_ref, legal_ref, w_ref, b_ref, out_ref):
    f32 = jnp.float32
    bf16 = jnp.bfloat16

    x = feature_ref[...]                 # (TM, FEATURE_LEN) bf16
    legal = legal_ref[...]               # (TM, ACTION_NUM) f32 (0/1)

    # Static slices of the resident parameter slabs (zero-cost views -> loads).
    w1 = w_ref[W1_OFF:W1_OFF + FEATURE_LEN, 0:H1]               # (32, 128)  bf16
    w2 = w_ref[W2_OFF:W2_OFF + H1, 0:H2]                        # (128, 256) bf16
    wh1 = w_ref[WH1_OFF:WH1_OFF + H2, 0:HEADS_HIDDEN]           # (256, 128) bf16
    wh2 = w_ref[WH2_OFF:WH2_OFF + HEADS_HIDDEN, 0:OUT_W]        # (128, 32)  bf16

    b1 = b_ref[0:1, 0:H1]
    b2 = b_ref[1:2, 0:H2]
    bh1 = b_ref[2:3, 0:HEADS_HIDDEN]
    bh2 = b_ref[3:4, 0:OUT_W]

    # main_mlp_net: Linear -> ReLU -> Linear -> ReLU  (non_linearity_last=True).
    # f32 MXU accumulation, activations carried in bf16 between layers.
    h = jnp.maximum(jnp.dot(x, w1, preferred_element_type=f32) + b1, 0.0).astype(bf16)
    h = jnp.maximum(jnp.dot(h, w2, preferred_element_type=f32) + b2, 0.0).astype(bf16)

    # Fused heads: first layers concatenated ([lw1 | vw1]), second layers
    # block-diagonal packed into a single (128, 32) matmul.
    hh = jnp.maximum(jnp.dot(h, wh1, preferred_element_type=f32) + bh1, 0.0).astype(bf16)
    head = jnp.dot(hh, wh2, preferred_element_type=f32) + bh2    # (TM, 32) f32
    # head columns: [0, ACTION_NUM) = label logits, [ACTION_NUM] = value,
    # [ACTION_NUM+1, 32) = exact zeros (zero-padded wh2/bh2 columns).

    # process_legal_action (exact PyTorch semantics).
    label = head[:, 0:ACTION_NUM]                                 # (TM, 16)
    label_max = jnp.max(label * legal, axis=1, keepdims=True)
    lbl = (label - label_max) * legal + 100000.0 * (legal - 1.0)

    # softmax(dim=1). The second max-subtraction is dropped: after the legal
    # transform lbl <= 0 on every legal column and -1e5 on illegal ones, so exp
    # cannot overflow.  Assumes >= 1 legal action per row (an all-illegal row is
    # degenerate in the PyTorch reference as well).
    e = jnp.exp(lbl)
    denom = jnp.sum(e, axis=1, keepdims=True)
    prob = e * pl.reciprocal(denom, approx=True)

    # Lane-dense 32-wide output slab: write head once (value + exact-zero padding),
    # then overwrite the first 16 lanes with the probabilities.
    out_ref[...] = head
    out_ref[:, 0:ACTION_NUM] = prob


def _round_up(x, m):
    return ((x + m - 1) // m) * m


def _tiling(batch):
    """Pick batch tile TM, grid length and padded batch Bp."""
    if batch < 256:
        tm = _round_up(max(batch, 8), 8)      # single fat block; splitting tiny
        return tm, 1, tm                      # batches only adds step overhead
    # Large batch: biggest tile up to TM_MAX, at least 2 grid steps so the
    # "parallel" axis keeps both v7x TensorCores busy.
    tm = min(TM_MAX, _round_up(-(-batch // 2), 128))
    grid = -(-batch // tm)
    return tm, grid, grid * tm


@partial(jax.jit, static_argnums=(4,))
def _forward_impl(feature, legal_action, w_slab, b_slab, resident_params):
    B = feature.shape[0]
    TM, grid, Bp = _tiling(B)

    feat = feature.astype(jnp.bfloat16)                 # bf16 feeds the MXU anyway
    legal = legal_action.astype(jnp.float32)
    if Bp != B:
        feat = jnp.zeros((Bp, FEATURE_LEN), jnp.bfloat16).at[:B].set(feat)
        legal = jnp.zeros((Bp, ACTION_NUM), jnp.float32).at[:B].set(legal)

    # Resident parameters: constant index_map; Buffered(1) avoids double-buffering
    # ~280 KiB of never-changing weights (VMEM headroom, mostly relevant on v7x).
    param_kw = dict(pipeline_mode=pl.Buffered(1)) if resident_params else {}

    out = pl.pallas_call(
        network_kernel,
        out_shape=jax.ShapeDtypeStruct((Bp, OUT_W), jnp.float32),
        grid_spec=pltpu.PrefetchScalarGridSpec(
            num_scalar_prefetch=0,
            grid=(grid,),
            in_specs=[
                pl.BlockSpec((TM, FEATURE_LEN), lambda i: (i, 0)),
                pl.BlockSpec((TM, ACTION_NUM), lambda i: (i, 0)),
                pl.BlockSpec((W_ROWS, W_COLS), lambda i: (0, 0), **param_kw),
                pl.BlockSpec((B_ROWS, W_COLS), lambda i: (0, 0), **param_kw),
            ],
            out_specs=pl.BlockSpec((TM, OUT_W), lambda i: (i, 0)),
        ),
        compiler_params=pltpu.CompilerParams(
            dimension_semantics=("parallel",),
            # Plenty for TM<=1024 (~3 MiB live); raised above v5e's 16 MiB default
            # so the tile can be pushed further without recompiling the wrapper.
            vmem_limit_bytes=32 * 1024 * 1024,
        ),
    )(feat, legal, w_slab, b_slab)

    prob = out[:B, :ACTION_NUM]
    value = out[:B, ACTION_NUM:ACTION_NUM + VALUE_NUM]
    return prob, value


def network_forward(feature, legal_action, w_slab, b_slab):
    """feature: [B, FEATURE_LEN] f32, legal_action: [B, ACTION_NUM] f32 -> (prob, value)."""
    try:
        return _forward_impl(feature, legal_action, w_slab, b_slab, True)
    except Exception:
        # Fallback if pipeline_mode=pl.Buffered(1) is not supported by this JAX
        # build for top-level pallas_call BlockSpecs; semantics are identical.
        return _forward_impl(feature, legal_action, w_slab, b_slab, False)


def make_params(key):
    """Per-layer f32 parameters: weights (in, out) (orthogonal-ish, like
    nn.init.orthogonal), small random biases so bias packing is exercised."""
    dims_all = [
        [FEATURE_LEN, H1, H2],        # main_mlp
        [H2, HH, ACTION_NUM],         # label_mlp
        [H2, HH, VALUE_NUM],          # value_mlp
    ]
    params = []
    for dims in dims_all:
        for i in range(len(dims) - 1):
            d_in, d_out = dims[i], dims[i + 1]
            key, kw, kb = jax.random.split(key, 3)
            a = jax.random.normal(kw, (max(d_in, d_out), min(d_in, d_out)),
                                  dtype=jnp.float32)
            q, _ = jnp.linalg.qr(a)
            w = q if d_in >= d_out else q.T
            w = w[:d_in, :d_out]
            b = 0.1 * jax.random.normal(kb, (d_out,), dtype=jnp.float32)
            params += [w.astype(jnp.float32), b]
    return params


def pack_params(params):
    """Pack 6 weights + 6 biases into one bf16 weight slab and one f32 bias slab."""
    (mw1, mb1, mw2, mb2, lw1, lb1, lw2, lb2, vw1, vb1, vw2, vb2) = params

    w = jnp.zeros((W_ROWS, W_COLS), jnp.float32)
    w = w.at[W1_OFF:W1_OFF + FEATURE_LEN, 0:H1].set(mw1)
    w = w.at[W2_OFF:W2_OFF + H1, 0:H2].set(mw2)
    w = w.at[WH1_OFF:WH1_OFF + H2, 0:HH].set(lw1)
    w = w.at[WH1_OFF:WH1_OFF + H2, HH:2 * HH].set(vw1)
    w = w.at[WH2_OFF:WH2_OFF + HH, 0:ACTION_NUM].set(lw2)
    w = w.at[WH2_OFF + HH:WH2_OFF + 2 * HH,
             ACTION_NUM:ACTION_NUM + VALUE_NUM].set(vw2)
    w_slab = w.astype(jnp.bfloat16)

    b = jnp.zeros((B_ROWS, W_COLS), jnp.float32)
    b = b.at[0, 0:H1].set(mb1)
    b = b.at[1, 0:H2].set(mb2)
    b = b.at[2, 0:HH].set(lb1)
    b = b.at[2, HH:2 * HH].set(vb1)
    b = b.at[3, 0:ACTION_NUM].set(lb2)
    b = b.at[3, ACTION_NUM:ACTION_NUM + VALUE_NUM].set(vb2)
    return w_slab, b


def reference_forward(feature, legal_action, params):
    """Pure-JAX reference matching the kernel's bf16-weight / f32-accum math."""
    (mw1, mb1, mw2, mb2, lw1, lb1, lw2, lb2, vw1, vb1, vw2, vb2) = params
    bf16 = jnp.bfloat16

    def lin(x, w, b):
        return jnp.dot(x.astype(bf16), w.astype(bf16),
                       preferred_element_type=jnp.float32) + b

    h = jax.nn.relu(lin(feature, mw1, mb1))
    h = jax.nn.relu(lin(h, mw2, mb2))
    lbl = lin(jax.nn.relu(lin(h, lw1, lb1)), lw2, lb2)
    val = lin(jax.nn.relu(lin(h, vw1, vb1)), vw2, vb2)

    lmax = jnp.max(lbl * legal_action, axis=1, keepdims=True)
    lbl = (lbl - lmax) * legal_action + 100000.0 * (legal_action - 1.0)
    prob = jax.nn.softmax(lbl, axis=1)
    return prob, val


if __name__ == "__main__":
    key = jax.random.PRNGKey(0)
    kf, kp = jax.random.split(key)

    params = make_params(kp)
    w_slab, b_slab = pack_params(params)

    # Test the single-block path (B=8) and the gridded/megacore path (B=512, grid=2).
    for batch in (8, 512):
        kfb, klb = jax.random.split(jax.random.fold_in(kf, batch))
        feature = jax.random.normal(kfb, (batch, FEATURE_LEN), dtype=jnp.float32)
        legal_action = (jax.random.uniform(klb, (batch, ACTION_NUM)) > 0.3
                        ).astype(jnp.float32)
        legal_action = legal_action.at[:, 0].set(1.0)   # >= 1 legal action per row

        prob, value = network_forward(feature, legal_action, w_slab, b_slab)
        jax.block_until_ready((prob, value))

        prob_ref, value_ref = reference_forward(feature, legal_action, params)
        assert prob.shape == (batch, ACTION_NUM)
        assert value.shape == (batch, VALUE_NUM)
        assert jnp.allclose(prob, prob_ref, atol=5e-3, rtol=5e-3), "prob mismatch"
        assert jnp.allclose(value, value_ref, atol=5e-3, rtol=5e-3), "value mismatch"

    print("KERNEL_OK")
</pallas_src>

<mosaic_0001>
module attributes {stable_mosaic.version = 11 : i64} {
  func.func @network_kernel(%arg0: i32, %arg1: memref<8x32xbf16, #tpu.memory_space<vmem>>, %arg2: memref<8x16xf32, #tpu.memory_space<vmem>>, %arg3: memref<544x256xbf16, #tpu.memory_space<vmem>>, %arg4: memref<8x256xf32, #tpu.memory_space<vmem>>, %arg5: memref<8x32xf32, #tpu.memory_space<vmem>>) attributes {dimension_semantics = [#tpu.dimension_semantics<parallel>], iteration_bounds = array<i64: 1>, scalar_prefetch = 0 : i64, scratch_operands = 0 : i64, tpu.core_type = #tpu.core_type<tc>, window_params = [{transform_indices = @transform_0, window_bounds = array<i64: 8, 32>}, {transform_indices = @transform_1, window_bounds = array<i64: 8, 16>}, {pipeline_mode = #tpu.pipeline_mode<synchronous>, transform_indices = @transform_2, window_bounds = array<i64: 544, 256>}, {pipeline_mode = #tpu.pipeline_mode<synchronous>, transform_indices = @transform_3, window_bounds = array<i64: 8, 256>}, {transform_indices = @transform_4, window_bounds = array<i64: 8, 32>}]} {
    %c0 = arith.constant 0 : index
    %c0_0 = arith.constant 0 : index
    %0 = vector.load %arg1[%c0, %c0_0] : memref<8x32xbf16, #tpu.memory_space<vmem>>, vector<8x32xbf16>
    %c0_1 = arith.constant 0 : index
    %c0_2 = arith.constant 0 : index
    %1 = vector.load %arg2[%c0_1, %c0_2] : memref<8x16xf32, #tpu.memory_space<vmem>>, vector<8x16xf32>
    %c0_3 = arith.constant 0 : index
    %c0_4 = arith.constant 0 : index
    %2 = vector.load %arg3[%c0_3, %c0_4] : memref<544x256xbf16, #tpu.memory_space<vmem>>, vector<32x128xbf16>
    %c32 = arith.constant 32 : index
    %c0_5 = arith.constant 0 : index
    %3 = vector.load %arg3[%c32, %c0_5] : memref<544x256xbf16, #tpu.memory_space<vmem>>, vector<128x256xbf16>
    %c160 = arith.constant 160 : index
    %c0_6 = arith.constant 0 : index
    %4 = vector.load %arg3[%c160, %c0_6] : memref<544x256xbf16, #tpu.memory_space<vmem>>, vector<256x128xbf16>
    %c416 = arith.constant 416 : index
    %c0_7 = arith.constant 0 : index
    %5 = vector.load %arg3[%c416, %c0_7] : memref<544x256xbf16, #tpu.memory_space<vmem>>, vector<128x32xbf16>
    %c0_8 = arith.constant 0 : index
    %c0_9 = arith.constant 0 : index
    %6 = vector.load %arg4[%c0_8, %c0_9] : memref<8x256xf32, #tpu.memory_space<vmem>>, vector<1x128xf32>
    %c1 = arith.constant 1 : index
    %c0_10 = arith.constant 0 : index
    %7 = vector.load %arg4[%c1, %c0_10] : memref<8x256xf32, #tpu.memory_space<vmem>>, vector<1x256xf32>
    %c2 = arith.constant 2 : index
    %c0_11 = arith.constant 0 : index
    %8 = vector.load %arg4[%c2, %c0_11] : memref<8x256xf32, #tpu.memory_space<vmem>>, vector<1x128xf32>
    %c3 = arith.constant 3 : index
    %c0_12 = arith.constant 0 : index
    %9 = vector.load %arg4[%c3, %c0_12] : memref<8x256xf32, #tpu.memory_space<vmem>>, vector<1x32xf32>
    %cst = arith.constant dense<0.000000e+00> : vector<8x128xf32>
    %10 = tpu.matmul %0, %2, %cst {dimension_numbers = #tpu.dot_dimension_numbers<[1], [0], [0], [1], [0, 0, 1, 1], [], []>} : vector<8x32xbf16>, vector<32x128xbf16>, vector<8x128xf32> -> vector<8x128xf32>
    %11 = vector.broadcast %6 : vector<1x128xf32> to vector<8x128xf32>
    %12 = arith.addf %10, %11 : vector<8x128xf32>
    %cst_13 = arith.constant 0.000000e+00 : f32
    %13 = vector.broadcast %cst_13 : f32 to vector<8x128xf32>
    %14 = arith.maximumf %12, %13 : vector<8x128xf32>
    %15 = arith.truncf %14 : vector<8x128xf32> to vector<8x128xbf16>
    %cst_14 = arith.constant dense<0.000000e+00> : vector<8x256xf32>
    %16 = tpu.matmul %15, %3, %cst_14 {dimension_numbers = #tpu.dot_dimension_numbers<[1], [0], [0], [1], [0, 0, 1, 1], [], []>} : vector<8x128xbf16>, vector<128x256xbf16>, vector<8x256xf32> -> vector<8x256xf32>
    %17 = vector.broadcast %7 : vector<1x256xf32> to vector<8x256xf32>
    %18 = arith.addf %16, %17 : vector<8x256xf32>
    %cst_15 = arith.constant 0.000000e+00 : f32
    %19 = vector.broadcast %cst_15 : f32 to vector<8x256xf32>
    %20 = arith.maximumf %18, %19 : vector<8x256xf32>
    %21 = arith.truncf %20 : vector<8x256xf32> to vector<8x256xbf16>
    %cst_16 = arith.constant dense<0.000000e+00> : vector<8x128xf32>
    %22 = tpu.matmul %21, %4, %cst_16 {dimension_numbers = #tpu.dot_dimension_numbers<[1], [0], [0], [1], [0, 0, 1, 1], [], []>} : vector<8x256xbf16>, vector<256x128xbf16>, vector<8x128xf32> -> vector<8x128xf32>
    %23 = vector.broadcast %8 : vector<1x128xf32> to vector<8x128xf32>
    %24 = arith.addf %22, %23 : vector<8x128xf32>
    %cst_17 = arith.constant 0.000000e+00 : f32
    %25 = vector.broadcast %cst_17 : f32 to vector<8x128xf32>
    %26 = arith.maximumf %24, %25 : vector<8x128xf32>
    %27 = arith.truncf %26 : vector<8x128xf32> to vector<8x128xbf16>
    %cst_18 = arith.constant dense<0.000000e+00> : vector<8x32xf32>
    %28 = tpu.matmul %27, %5, %cst_18 {dimension_numbers = #tpu.dot_dimension_numbers<[1], [0], [0], [1], [0, 0, 1, 1], [], []>} : vector<8x128xbf16>, vector<128x32xbf16>, vector<8x32xf32> -> vector<8x32xf32>
    %29 = vector.broadcast %9 : vector<1x32xf32> to vector<8x32xf32>
    %30 = arith.addf %28, %29 : vector<8x32xf32>
    %31 = vector.extract_strided_slice %30 {offsets = [0, 0], sizes = [8, 16], strides = [1, 1]} : vector<8x32xf32> to vector<8x16xf32>
    %32 = arith.mulf %31, %1 : vector<8x16xf32>
    %cst_19 = arith.constant dense<0xFF800000> : vector<8xf32>
    %33 = vector.multi_reduction <maximumf>, %32, %cst_19 [1] : vector<8x16xf32> to vector<8xf32>
    %34 = vector.shape_cast %33 : vector<8xf32> to vector<8x1xf32>
    %35 = vector.broadcast %34 : vector<8x1xf32> to vector<8x16xf32>
    %36 = arith.subf %31, %35 : vector<8x16xf32>
    %37 = arith.mulf %36, %1 : vector<8x16xf32>
    %cst_20 = arith.constant 1.000000e+00 : f32
    %38 = vector.broadcast %cst_20 : f32 to vector<8x16xf32>
    %39 = arith.subf %1, %38 : vector<8x16xf32>
    %cst_21 = arith.constant 1.000000e+05 : f32
    %40 = vector.broadcast %cst_21 : f32 to vector<8x16xf32>
    %41 = arith.mulf %40, %39 : vector<8x16xf32>
    %42 = arith.addf %37, %41 : vector<8x16xf32>
    %43 = math.exp %42 : vector<8x16xf32>
    %cst_22 = arith.constant dense<0.000000e+00> : vector<8xf32>
    %44 = vector.multi_reduction <add>, %43, %cst_22 [1] : vector<8x16xf32> to vector<8xf32>
    %45 = vector.shape_cast %44 : vector<8xf32> to vector<8x1xf32>
    %46 = tpu.reciprocal %45 {approx = true} : vector<8x1xf32> -> vector<8x1xf32>
    %47 = vector.broadcast %46 : vector<8x1xf32> to vector<8x16xf32>
    %48 = arith.mulf %43, %47 : vector<8x16xf32>
    %c0_23 = arith.constant 0 : index
    %c0_24 = arith.constant 0 : index
    %49 = vector.load %arg5[%c0_23, %c0_24] : memref<8x32xf32, #tpu.memory_space<vmem>>, vector<8x32xf32>
    tpu.vector_store %arg5[%c0_23, %c0_24], %30 {strides = array<i32>} : memref<8x32xf32, #tpu.memory_space<vmem>>, vector<8x32xf32>,
    %c0_25 = arith.constant 0 : index
    %c0_26 = arith.constant 0 : index
    %50 = vector.load %arg5[%c0_25, %c0_26] : memref<8x32xf32, #tpu.memory_space<vmem>>, vector<8x16xf32>
    tpu.vector_store %arg5[%c0_25, %c0_26], %48 {strides = array<i32>} : memref<8x32xf32, #tpu.memory_space<vmem>>, vector<8x16xf32>,
    return
  }
  func.func @transform_0(%arg0: i32) -> (i32, i32) {
    %c0_i32 = arith.constant 0 : i32
    %c0_i32_0 = arith.constant 0 : i32
    return %arg0, %c0_i32 : i32, i32
  }
  func.func @transform_1(%arg0: i32) -> (i32, i32) {
    %c0_i32 = arith.constant 0 : i32
    %c0_i32_0 = arith.constant 0 : i32
    return %arg0, %c0_i32 : i32, i32
  }
  func.func @transform_2(%arg0: i32) -> (i32, i32) {
    %c0_i32 = arith.constant 0 : i32
    %c0_i32_0 = arith.constant 0 : i32
    %c0_i32_1 = arith.constant 0 : i32
    return %c0_i32, %c0_i32_0 : i32, i32
  }
  func.func @transform_3(%arg0: i32) -> (i32, i32) {
    %c0_i32 = arith.constant 0 : i32
    %c0_i32_0 = arith.constant 0 : i32
    %c0_i32_1 = arith.constant 0 : i32
    return %c0_i32, %c0_i32_0 : i32, i32
  }
  func.func @transform_4(%arg0: i32) -> (i32, i32) {
    %c0_i32 = arith.constant 0 : i32
    %c0_i32_0 = arith.constant 0 : i32
    return %arg0, %c0_i32 : i32, i32
  }
}

module attributes {stable_mosaic.version = 11 : i64} {
  func.func @network_kernel(%arg0: i32, %arg1: memref<8x32xbf16, #tpu.memory_space<vmem>>, %arg2: memref<8x16xf32, #tpu.memory_space<vmem>>, %arg3: memref<544x256xbf16, #tpu.memory_space<vmem>>, %arg4: memref<8x256xf32, #tpu.memory_space<vmem>>, %arg5: memref<8x32xf32, #tpu.memory_space<vmem>>) attributes {dimension_semantics = [#tpu.dimension_semantics<parallel>], iteration_bounds = array<i64: 1>, scalar_prefetch = 0 : i64, scratch_operands = 0 : i64, tpu.core_type = #tpu.core_type<tc>, window_params = [{transform_indices = @transform_0, window_bounds = array<i64: 8, 32>}, {transform_indices = @transform_1, window_bounds = array<i64: 8, 16>}, {pipeline_mode = #tpu.pipeline_mode<synchronous>, transform_indices = @transform_2, window_bounds = array<i64: 544, 256>}, {pipeline_mode = #tpu.pipeline_mode<synchronous>, transform_indices = @transform_3, window_bounds = array<i64: 8, 256>}, {transform_indices = @transform_4, window_bounds = array<i64: 8, 32>}]} {
    %c0 = arith.constant 0 : index
    %c0_0 = arith.constant 0 : index
    %0 = vector.load %arg1[%c0, %c0_0] : memref<8x32xbf16, #tpu.memory_space<vmem>>, vector<8x32xbf16>
    %c0_1 = arith.constant 0 : index
    %c0_2 = arith.constant 0 : index
    %1 = vector.load %arg2[%c0_1, %c0_2] : memref<8x16xf32, #tpu.memory_space<vmem>>, vector<8x16xf32>
    %c0_3 = arith.constant 0 : index
    %c0_4 = arith.constant 0 : index
    %2 = vector.load %arg3[%c0_3, %c0_4] : memref<544x256xbf16, #tpu.memory_space<vmem>>, vector<32x128xbf16>
    %c32 = arith.constant 32 : index
    %c0_5 = arith.constant 0 : index
    %3 = vector.load %arg3[%c32, %c0_5] : memref<544x256xbf16, #tpu.memory_space<vmem>>, vector<128x256xbf16>
    %c160 = arith.constant 160 : index
    %c0_6 = arith.constant 0 : index
    %4 = vector.load %arg3[%c160, %c0_6] : memref<544x256xbf16, #tpu.memory_space<vmem>>, vector<256x128xbf16>
    %c416 = arith.constant 416 : index
    %c0_7 = arith.constant 0 : index
    %5 = vector.load %arg3[%c416, %c0_7] : memref<544x256xbf16, #tpu.memory_space<vmem>>, vector<128x32xbf16>
    %c0_8 = arith.constant 0 : index
    %c0_9 = arith.constant 0 : index
    %6 = vector.load %arg4[%c0_8, %c0_9] : memref<8x256xf32, #tpu.memory_space<vmem>>, vector<1x128xf32>
    %c1 = arith.constant 1 : index
    %c0_10 = arith.constant 0 : index
    %7 = vector.load %arg4[%c1, %c0_10] : memref<8x256xf32, #tpu.memory_space<vmem>>, vector<1x256xf32>
    %c2 = arith.constant 2 : index
    %c0_11 = arith.constant 0 : index
    %8 = vector.load %arg4[%c2, %c0_11] : memref<8x256xf32, #tpu.memory_space<vmem>>, vector<1x128xf32>
    %c3 = arith.constant 3 : index
    %c0_12 = arith.constant 0 : index
    %9 = vector.load %arg4[%c3, %c0_12] : memref<8x256xf32, #tpu.memory_space<vmem>>, vector<1x32xf32>
    %cst = arith.constant dense<0.000000e+00> : vector<8x128xf32>
    %10 = tpu.matmul %0, %2, %cst {dimension_numbers = #tpu.dot_dimension_numbers<[1], [0], [0], [1], [0, 0, 1, 1], [], []>} : vector<8x32xbf16>, vector<32x128xbf16>, vector<8x128xf32> -> vector<8x128xf32>
    %11 = vector.broadcast %6 : vector<1x128xf32> to vector<8x128xf32>
    %12 = arith.addf %10, %11 : vector<8x128xf32>
    %cst_13 = arith.constant 0.000000e+00 : f32
    %13 = vector.broadcast %cst_13 : f32 to vector<8x128xf32>
    %14 = arith.maximumf %12, %13 : vector<8x128xf32>
    %15 = arith.truncf %14 : vector<8x128xf32> to vector<8x128xbf16>
    %cst_14 = arith.constant dense<0.000000e+00> : vector<8x256xf32>
    %16 = tpu.matmul %15, %3, %cst_14 {dimension_numbers = #tpu.dot_dimension_numbers<[1], [0], [0], [1], [0, 0, 1, 1], [], []>} : vector<8x128xbf16>, vector<128x256xbf16>, vector<8x256xf32> -> vector<8x256xf32>
    %17 = vector.broadcast %7 : vector<1x256xf32> to vector<8x256xf32>
    %18 = arith.addf %16, %17 : vector<8x256xf32>
    %cst_15 = arith.constant 0.000000e+00 : f32
    %19 = vector.broadcast %cst_15 : f32 to vector<8x256xf32>
    %20 = arith.maximumf %18, %19 : vector<8x256xf32>
    %21 = arith.truncf %20 : vector<8x256xf32> to vector<8x256xbf16>
    %cst_16 = arith.constant dense<0.000000e+00> : vector<8x128xf32>
    %22 = tpu.matmul %21, %4, %cst_16 {dimension_numbers = #tpu.dot_dimension_numbers<[1], [0], [0], [1], [0, 0, 1, 1], [], []>} : vector<8x256xbf16>, vector<256x128xbf16>, vector<8x128xf32> -> vector<8x128xf32>
    %23 = vector.broadcast %8 : vector<1x128xf32> to vector<8x128xf32>
    %24 = arith.addf %22, %23 : vector<8x128xf32>
    %cst_17 = arith.constant 0.000000e+00 : f32
    %25 = vector.broadcast %cst_17 : f32 to vector<8x128xf32>
    %26 = arith.maximumf %24, %25 : vector<8x128xf32>
    %27 = arith.truncf %26 : vector<8x128xf32> to vector<8x128xbf16>
    %cst_18 = arith.constant dense<0.000000e+00> : vector<8x32xf32>
    %28 = tpu.matmul %27, %5, %cst_18 {dimension_numbers = #tpu.dot_dimension_numbers<[1], [0], [0], [1], [0, 0, 1, 1], [], []>} : vector<8x128xbf16>, vector<128x32xbf16>, vector<8x32xf32> -> vector<8x32xf32>
    %29 = vector.broadcast %9 : vector<1x32xf32> to vector<8x32xf32>
    %30 = arith.addf %28, %29 : vector<8x32xf32>
    %31 = vector.extract_strided_slice %30 {offsets = [0, 0], sizes = [8, 16], strides = [1, 1]} : vector<8x32xf32> to vector<8x16xf32>
    %32 = arith.mulf %31, %1 : vector<8x16xf32>
    %cst_19 = arith.constant dense<0xFF800000> : vector<8xf32>
    %33 = vector.multi_reduction <maximumf>, %32, %cst_19 [1] : vector<8x16xf32> to vector<8xf32>
    %34 = vector.shape_cast %33 : vector<8xf32> to vector<8x1xf32>
    %35 = vector.broadcast %34 : vector<8x1xf32> to vector<8x16xf32>
    %36 = arith.subf %31, %35 : vector<8x16xf32>
    %37 = arith.mulf %36, %1 : vector<8x16xf32>
    %cst_20 = arith.constant 1.000000e+00 : f32
    %38 = vector.broadcast %cst_20 : f32 to vector<8x16xf32>
    %39 = arith.subf %1, %38 : vector<8x16xf32>
    %cst_21 = arith.constant 1.000000e+05 : f32
    %40 = vector.broadcast %cst_21 : f32 to vector<8x16xf32>
    %41 = arith.mulf %40, %39 : vector<8x16xf32>
    %42 = arith.addf %37, %41 : vector<8x16xf32>
    %43 = math.exp %42 : vector<8x16xf32>
    %cst_22 = arith.constant dense<0.000000e+00> : vector<8xf32>
    %44 = vector.multi_reduction <add>, %43, %cst_22 [1] : vector<8x16xf32> to vector<8xf32>
    %45 = vector.shape_cast %44 : vector<8xf32> to vector<8x1xf32>
    %46 = tpu.reciprocal %45 {approx = true} : vector<8x1xf32> -> vector<8x1xf32>
    %47 = vector.broadcast %46 : vector<8x1xf32> to vector<8x16xf32>
    %48 = arith.mulf %43, %47 : vector<8x16xf32>
    %c0_23 = arith.constant 0 : index
    %c0_24 = arith.constant 0 : index
    %49 = vector.load %arg5[%c0_23, %c0_24] : memref<8x32xf32, #tpu.memory_space<vmem>>, vector<8x32xf32>
    tpu.vector_store %arg5[%c0_23, %c0_24], %30 {strides = array<i32>} : memref<8x32xf32, #tpu.memory_space<vmem>>, vector<8x32xf32>,
    %c0_25 = arith.constant 0 : index
    %c0_26 = arith.constant 0 : index
    %50 = vector.load %arg5[%c0_25, %c0_26] : memref<8x32xf32, #tpu.memory_space<vmem>>, vector<8x16xf32>
    tpu.vector_store %arg5[%c0_25, %c0_26], %48 {strides = array<i32>} : memref<8x32xf32, #tpu.memory_space<vmem>>, vector<8x16xf32>,
    return
  }
  func.func @transform_0(%arg0: i32) -> (i32, i32) {
    %c0_i32 = arith.constant 0 : i32
    %c0_i32_0 = arith.constant 0 : i32
    return %arg0, %c0_i32 : i32, i32
  }
  func.func @transform_1(%arg0: i32) -> (i32, i32) {
    %c0_i32 = arith.constant 0 : i32
    %c0_i32_0 = arith.constant 0 : i32
    return %arg0, %c0_i32 : i32, i32
  }
  func.func @transform_2(%arg0: i32) -> (i32, i32) {
    %c0_i32 = arith.constant 0 : i32
    %c0_i32_0 = arith.constant 0 : i32
    %c0_i32_1 = arith.constant 0 : i32
    return %c0_i32, %c0_i32_0 : i32, i32
  }
  func.func @transform_3(%arg0: i32) -> (i32, i32) {
    %c0_i32 = arith.constant 0 : i32
    %c0_i32_0 = arith.constant 0 : i32
    %c0_i32_1 = arith.constant 0 : i32
    return %c0_i32, %c0_i32_0 : i32, i32
  }
  func.func @transform_4(%arg0: i32) -> (i32, i32) {
    %c0_i32 = arith.constant 0 : i32
    %c0_i32_0 = arith.constant 0 : i32
    return %arg0, %c0_i32 : i32, i32
  }
}

</mosaic_0001>

<bundles_post_ra>
// kernel: _forward_impl.1
= control target key start
LH: loop header
LB: loop body
LE: loop exit
PB: predicated region body
PF: predicated region fallthrough
CT: control target
= control target key end

     0   :  { %9 = vsyncpa [#allocation3], 0  ;;  %s803_s0 = inlined_call_operand.vmem [shape: bf16[8,32], index: 0, kind: input, shape index: {}]   ;;  %s804_s1 = inlined_call_operand.vmem [shape: f32[8,16], index: 1, kind: input, shape index: {}]   ;;  %s805_s2 = inlined_call_operand.hbm [shape: bf16[544,256], index: 2, kind: input, shape index: {}]   ;;  %s806_s3 = inlined_call_operand.hbm [shape: f32[8,256], index: 3, kind: input, shape index: {}]   ;;  %s807_s4 = inlined_call_operand.vmem [shape: f32[8,32], index: 4, kind: output, shape index: {}]  }
   0x1   :  { %s19_s17 = sshll.u32 %s805_s2, 4  ;;  %s20_s17 = int_to_ptr.hbm [resolvable:$true] %s19_s17 }
   0x2   :  { %10 = vsyncpa [#allocation5], 0  ;;  %s751_s18 = smov [#allocation2]   ;;  %s33_s22 = sshll.u32 %s806_s3, 4  ;;  %s34_s22 = int_to_ptr.hbm [resolvable:$true] %s33_s22 }
   0x3   :  { %s21_s19 = sshll.u32 %s751_s18, 4  ;;  %s752_s23 = smov 128   ;;  %s22_s19 = int_to_ptr.vmem [resolvable:$true] %s21_s19 }
   0x4   :  { %s753_s24 = smov 8   ;;  %s754_s25 = smov [#allocation4]  }
   0x5   :  { %27 = dma.hbm_to_vmem [thread:$0]  %s20_s17, 8704, %s22_s19, [#allocation3], %s752_s23, %s752_s23, %s753_s24  }
   0x6   :  { %s35_s26 = sshll.u32 %s754_s25, 4  ;;  %s36_s26 = int_to_ptr.vmem [resolvable:$true] %s35_s26 }
   0x7   :  { %38 = dma.hbm_to_vmem [thread:$0]  %s34_s22, 256, %s36_s26, [#allocation5]  }
   0x8   :  { %747 = dma.done.wait [#allocation3], 8704  }
   0x9   :  { %748 = vsyncadd [#allocation3], 4294958592 }
   0xa   :  { %749 = dma.done.wait [#allocation5], 256  }
   0xb   :  { %750 = vsyncadd [#allocation5], 4294967040  ;;  %v485_v0 = vld [vmem:[#allocation2 + $0x10] sm:$0xf]  ;;  %v650_v1 = vld [vmem:[#allocation2 + $0x14] sm:$0xf0] }
   0xc   :  { %v481_v2 = vld [vmem:[#allocation2] sm:$0xf]  ;;  %v486_v3 = vor.u32 %v650_v1, %v485_v0  ;;  %v649_v4 = vld [vmem:[#allocation2 + $0x4] sm:$0xf0]  ;;  %v546_v5 = vld [vmem:[#allocation2 + $0x90] sm:$0xf] }
   0xd   :  { %v666_v6 = vld [vmem:[#allocation2 + $0x94] sm:$0xf0]  ;;  %v665_v7 = vld [vmem:[#allocation2 + $0x94] sm:$0xf]  ;;  %v548_v8 = vld [vmem:[#allocation2 + $0x98] sm:$0xf0]  ;;  %v482_v9 = vor.u32 %v649_v4, %v481_v2 }
   0xe   :  { %145 = vmatpush.bf16.msra.mxu0 %v486_v3  ;;  %v547_v10 = vor.u32 %v666_v6, %v546_v5  ;;  %v551_v11 = vor.u32 %v665_v7, %v548_v8  ;;  %v538_v12 = vld [vmem:[#allocation2 + $0x80] sm:$0xf]  ;;  %v664_v13 = vld [vmem:[#allocation2 + $0x84] sm:$0xf0]  ;;  %v663_v14 = vld [vmem:[#allocation2 + $0x84] sm:$0xf] }
   0xf   :  { %v540_v15 = vld [vmem:[#allocation2 + $0x88] sm:$0xf0]  ;;  %v539_v16 = vor.u32 %v664_v13, %v538_v12  ;;  %v530_v18 = vld [vmem:[#allocation2 + $0x70] sm:$0xf]  ;;  %v662_v19 = vld [vmem:[#allocation2 + $0x74] sm:$0xf0] }
  0x10   :  { %239 = vmatpush.bf16.msra.mxu1 %v547_v10  ;;  %252 = vmatpush.bf16.msra.mxu2 %v551_v11  ;;  %v543_v17 = vor.u32 %v663_v14, %v540_v15  ;;  %v661_v20 = vld [vmem:[#allocation2 + $0x74] sm:$0xf]  ;;  %v532_v21 = vld [vmem:[#allocation2 + $0x78] sm:$0xf0]  ;;  %v48_v22 = vld [vmem:[%s803_s0] sm:$0xf]  ;;  %v531_v23 = vor.u32 %v662_v19, %v530_v18 }
  0x11   :  { %vm135_vm0 = vcmask 261120   ;;  %v535_v24 = vor.u32 %v661_v20, %v532_v21  ;;  %v522_v25 = vld [vmem:[#allocation2 + $0x60] sm:$0xf]  ;;  %v660_v26 = vld [vmem:[#allocation2 + $0x64] sm:$0xf0]  ;;  %vm455_vm1 = vcmask 130048  }
  0x12   :  { %146 = vmatpush.bf16.msra.mxu0 %v482_v9  ;;  %v659_v27 = vld [vmem:[#allocation2 + $0x64] sm:$0xf]  ;;  %v524_v28 = vld [vmem:[#allocation2 + $0x68] sm:$0xf0]  ;;  %v523_v29 = vor.u32 %v660_v26, %v522_v25  ;;  %v514_v31 = vld [vmem:[#allocation2 + $0x50] sm:$0xf] }
  0x13   :  { %v527_v30 = vor.u32 %v659_v27, %v524_v28  ;;  %v658_v32 = vld [vmem:[#allocation2 + $0x54] sm:$0xf0]  ;;  %v657_v33 = vld [vmem:[#allocation2 + $0x54] sm:$0xf]  ;;  %v516_v34 = vld [vmem:[#allocation2 + $0x58] sm:$0xf0] }
  0x14   :  { %240 = vmatpush.bf16.msra.mxu1 %v539_v16  ;;  %253 = vmatpush.bf16.msra.mxu2 %v543_v17  ;;  %v515_v35 = vor.u32 %v658_v32, %v514_v31  ;;  %v519_v36 = vor.u32 %v657_v33, %v516_v34  ;;  %v506_v37 = vld [vmem:[#allocation2 + $0x40] sm:$0xf]  ;;  %v656_v38 = vld [vmem:[#allocation2 + $0x44] sm:$0xf0]  ;;  %v655_v39 = vld [vmem:[#allocation2 + $0x44] sm:$0xf] }
  0x15   :  { %487 = vmatmul.msk.bf16.vlgmr.msra.gmra.mxu0 %vm135_vm0, %v48_v22  ;;  %v508_v40 = vld [vmem:[#allocation2 + $0x48] sm:$0xf0]  ;;  %v507_v41 = vor.u32 %v656_v38, %v506_v37  ;;  %v498_v43 = vld [vmem:[#allocation2 + $0x30] sm:$0xf]  ;;  %v654_v44 = vld [vmem:[#allocation2 + $0x34] sm:$0xf0] }
  0x16   :  { %v511_v42 = vor.u32 %v655_v39, %v508_v40  ;;  %v653_v45 = vld [vmem:[#allocation2 + $0x34] sm:$0xf]  ;;  %v499_v46 = vor.u32 %v654_v44, %v498_v43  ;;  %v500_v47 = vld [vmem:[#allocation2 + $0x38] sm:$0xf0]  ;;  %v490_v49 = vld [vmem:[#allocation2 + $0x20] sm:$0xf] }
  0x17   :  { %v503_v48 = vor.u32 %v653_v45, %v500_v47  ;;  %v652_v50 = vld [vmem:[#allocation2 + $0x24] sm:$0xf0]  ;;  %v651_v51 = vld [vmem:[#allocation2 + $0x24] sm:$0xf]  ;;  %v492_v53 = vld [vmem:[#allocation2 + $0x28] sm:$0xf0] }
  0x18   :  { %241 = vmatpush.bf16.msra.mxu1 %v531_v23  ;;  %254 = vmatpush.bf16.msra.mxu2 %v535_v24  ;;  %v491_v52 = vor.u32 %v652_v50, %v490_v49  ;;  %v495_v54 = vor.u32 %v651_v51, %v492_v53  ;;  %v582_v55 = vld [vmem:[#allocation2 + $0x110] sm:$0xf]  ;;  %v674_v56 = vld [vmem:[#allocation2 + $0x114] sm:$0xf0]  ;;  %v578_v57 = vld [vmem:[#allocation2 + $0x100] sm:$0xf] }
  0x19   :  { %v583_v58 = vor.u32 %v674_v56, %v582_v55  ;;  %v673_v59 = vld [vmem:[#allocation2 + $0x104] sm:$0xf0]  ;;  %v614_v60 = vld [vmem:[#allocation2 + $0x190] sm:$0xf]  ;;  %v682_v61 = vld [vmem:[#allocation2 + $0x194] sm:$0xf0] }
  0x1a   :  { %v615_v62 = vor.u32 %v682_v61, %v614_v60  ;;  %v610_v63 = vld [vmem:[#allocation2 + $0x180] sm:$0xf]  ;;  %v579_v0 = vor.u32 %v673_v59, %v578_v57  ;;  %v681_v1 = vld [vmem:[#allocation2 + $0x184] sm:$0xf0]  ;;  %v574_v2 = vld [vmem:[#allocation2 + $0xf0] sm:$0xf] }
  0x1b   :  { %365 = vmatpush.bf16.msra.mxu3 %v583_v58  ;;  %v672_v3 = vld [vmem:[#allocation2 + $0xf4] sm:$0xf0]  ;;  %v611_v4 = vor.u32 %v681_v1, %v610_v63  ;;  %v606_v5 = vld [vmem:[#allocation2 + $0x170] sm:$0xf]  ;;  %v570_v8 = vld [vmem:[#allocation2 + $0xe0] sm:$0xf] }
  0x1c   :  { %242 = vmatpush.bf16.msra.mxu1 %v523_v29  ;;  %255 = vmatpush.bf16.msra.mxu2 %v527_v30  ;;  %v680_v6 = vld [vmem:[#allocation2 + $0x174] sm:$0xf0]  ;;  %v575_v7 = vor.u32 %v672_v3, %v574_v2  ;;  %v671_v9 = vld [vmem:[#allocation2 + $0xe4] sm:$0xf0]  ;;  %v602_v11 = vld [vmem:[#allocation2 + $0x160] sm:$0xf] }
  0x1d   :  { %378 = vmatpush.bf16.msrb.mxu0 %v615_v62  ;;  %v607_v10 = vor.u32 %v680_v6, %v606_v5  ;;  %v679_v12 = vld [vmem:[#allocation2 + $0x164] sm:$0xf0]  ;;  %v571_v13 = vor.u32 %v671_v9, %v570_v8  ;;  %v566_v14 = vld [vmem:[#allocation2 + $0xd0] sm:$0xf]  ;;  %v670_v15 = vld [vmem:[#allocation2 + $0xd4] sm:$0xf0] }
  0x1e   :  { %v603_v16 = vor.u32 %v679_v12, %v602_v11  ;;  %v598_v17 = vld [vmem:[#allocation2 + $0x150] sm:$0xf]  ;;  %v678_v18 = vld [vmem:[#allocation2 + $0x154] sm:$0xf0]  ;;  %v567_v19 = vor.u32 %v670_v15, %v566_v14  ;;  %v562_v20 = vld [vmem:[#allocation2 + $0xc0] sm:$0xf] }
  0x1f   :  { %366 = vmatpush.bf16.msra.mxu3 %v579_v0  ;;  %v669_v21 = vld [vmem:[#allocation2 + $0xc4] sm:$0xf0]  ;;  %v599_v22 = vor.u32 %v678_v18, %v598_v17  ;;  %v118_v24 = vld [vmem:[#allocation4] ss:$0 sm:$0xff]  ;;  %v558_v30 = vld [vmem:[#allocation2 + $0xb0] sm:$0xf] }
  0x20   :  { %243 = vmatpush.bf16.msra.mxu1 %v515_v35  ;;  %256 = vmatpush.bf16.msra.mxu2 %v519_v36  ;;  %v563_v23 = vor.u32 %v669_v21, %v562_v20  ;;  %v668_v31 = vld [vmem:[#allocation2 + $0xb4] sm:$0xf0]  ;;  %v594_v33 = vld [vmem:[#allocation2 + $0x140] sm:$0xf]  ;;  %v677_v34 = vld [vmem:[#allocation2 + $0x144] sm:$0xf0] }
  0x21   :  { %379 = vmatpush.bf16.msrb.mxu0 %v611_v4  ;;  %v559_v32 = vor.u32 %v668_v31, %v558_v30  ;;  %v595_v35 = vor.u32 %v677_v34, %v594_v33  ;;  %v554_v36 = vld [vmem:[#allocation2 + $0xa0] sm:$0xf]  ;;  %v667_v37 = vld [vmem:[#allocation2 + $0xa4] sm:$0xf0]  ;;  %v590_v39 = vld [vmem:[#allocation2 + $0x130] sm:$0xf] }
  0x22   :  { %v555_v38 = vor.u32 %v667_v37, %v554_v36  ;;  %v676_v40 = vld [vmem:[#allocation2 + $0x134] sm:$0xf0]  ;;  %v675_v43 = vld [vmem:[#allocation2 + $0x124] sm:$0xf0]  ;;  %v646_v45 = vld [vmem:[#allocation2 + $0x210] sm:$0xf] }
  0x23   :  { %367 = vmatpush.bf16.msra.mxu3 %v575_v7  ;;  %v642_v47 = vld [vmem:[#allocation2 + $0x200] sm:$0xf]  ;;  %v689_v49 = vld [vmem:[#allocation2 + $0x204] sm:$0xf0]  ;;  %v638_v51 = vld [vmem:[#allocation2 + $0x1f0] sm:$0xf] }
  0x24   :  { %244 = vmatpush.bf16.msra.mxu1 %v507_v41  ;;  %257 = vmatpush.bf16.msra.mxu2 %v511_v42  ;;  %v591_v41 = vor.u32 %v676_v40, %v590_v39  ;;  %v586_v42 = vld [vmem:[#allocation2 + $0x120] sm:$0xf]  ;;  %v643_v50 = vor.u32 %v689_v49, %v642_v47  ;;  %v687_v55 = vld [vmem:[#allocation2 + $0x1e4] sm:$0xf0]  ;;  %v630_v58 = vld [vmem:[#allocation2 + $0x1d0] sm:$0xf] }
  0x25   :  { %380 = vmatpush.bf16.msrb.mxu0 %v607_v10  ;;  %v587_v44 = vor.u32 %v675_v43, %v586_v42  ;;  %v120_v56 = vld [vmem:[#allocation4 + $0x1] ss:$8 sm:$0x3]  ;;  %v686_v59 = vld [vmem:[#allocation2 + $0x1d4] sm:$0xf0] }
  0x26   :  { %v155_v60 = vperm.slane %v120_v56, 0  ;;  %v631_v61 = vor.u32 %v686_v59, %v630_v58  ;;  %v626_v62 = vld [vmem:[#allocation2 + $0x1c0] sm:$0xf]  ;;  %v685_v63 = vld [vmem:[#allocation2 + $0x1c4] sm:$0xf0]  ;;  %v156_v4 = vperm.slane %v120_v56, 1 }
  0x27   :  { %368 = vmatpush.bf16.msra.mxu3 %v571_v13  ;;  %v627_v2 = vor.u32 %v685_v63, %v626_v62  ;;  %v622_v12 = vld [vmem:[#allocation2 + $0x1b0] sm:$0xf]  ;;  %v684_v13 = vld [vmem:[#allocation2 + $0x1b4] sm:$0xf0]  ;;  %v618_v15 = vld [vmem:[#allocation2 + $0x1a0] sm:$0xf] }
  0x28   :  { %245 = vmatpush.bf16.msra.mxu1 %v499_v46  ;;  %258 = vmatpush.bf16.msra.mxu2 %v503_v48  ;;  %v690_v46 = vld [vmem:[#allocation2 + $0x214] sm:$0xf0]  ;;  %v623_v14 = vor.u32 %v684_v13, %v622_v12  ;;  %v121_v18 = vld [vmem:[#allocation4 + $0x2] ss:$0 sm:$0xff] }
  0x29   :  { %381 = vmatpush.bf16.msrb.mxu0 %v603_v16  ;;  %v647_v48 = vor.u32 %v690_v46, %v646_v45  ;;  %v683_v16 = vld [vmem:[#allocation2 + $0x1a4] sm:$0xf0] }
  0x2a   :  { %v619_v17 = vor.u32 %v683_v16, %v618_v15 }
  0x2b   :  { %369 = vmatpush.bf16.msra.mxu3 %v567_v19 }
  0x2c   :  { %246 = vmatpush.bf16.msra.mxu1 %v491_v52  ;;  %259 = vmatpush.bf16.msra.mxu2 %v495_v54  ;;  %v688_v52 = vld [vmem:[#allocation2 + $0x1f4] sm:$0xf0]  ;;  %v634_v54 = vld [vmem:[#allocation2 + $0x1e0] sm:$0xf] }
  0x2d   :  { %382 = vmatpush.bf16.msrb.mxu0 %v599_v22  ;;  %v639_v53 = vor.u32 %v688_v52, %v638_v51  ;;  %v635_v57 = vor.u32 %v687_v55, %v634_v54 }
  0x2f   :  { %370 = vmatpush.bf16.msra.mxu3 %v563_v23 }
  0x30   :  { %441 = vmatpush.bf16.msrb.mxu1 %v647_v48 }
  0x31   :  { %383 = vmatpush.bf16.msrb.mxu0 %v595_v35 }
  0x33   :  { %371 = vmatpush.bf16.msra.mxu3 %v559_v32 }
  0x34   :  { %442 = vmatpush.bf16.msrb.mxu1 %v643_v50 }
  0x35   :  { %384 = vmatpush.bf16.msrb.mxu0 %v591_v41 }
  0x37   :  { %372 = vmatpush.bf16.msra.mxu3 %v555_v38 }
  0x38   :  { %443 = vmatpush.bf16.msrb.mxu1 %v639_v53 }
  0x39   :  { %385 = vmatpush.bf16.msrb.mxu0 %v587_v44 }
  0x3c   :  { %444 = vmatpush.bf16.msrb.mxu1 %v635_v57 }
  0x40   :  { %445 = vmatpush.bf16.msrb.mxu1 %v631_v61 }
  0x44   :  { %446 = vmatpush.bf16.msrb.mxu1 %v627_v2 }
  0x48   :  { %447 = vmatpush.bf16.msrb.mxu1 %v623_v14 }
  0x4c   :  { %448 = vmatpush.bf16.msrb.mxu1 %v619_v17 }
  0x92   :  { %v148_v25 = vpop.f32.mrf.mxu0 }
  0x93   :  { %v149_v26 = vadd.f32 %v148_v25, %v118_v24 }
  0x95   :  { %v152_v27 = vmax.f32 %v149_v26, 0.0 }
  0x97   :  { %v153_v28 = vpack.c.bf16 %v152_v27, %v152_v27  ;;  %v122_v27 = vld [vmem:[#allocation4 + $0x3] ss:$0 sm:$0xff] }
  0x99   :  { %247 = vmatmul.bf16.vlgmr.msra.gmra.mxu1 %v153_v28  ;;  %260 = vmatmul.bf16.vlgmr.msra.gmra.mxu2 %v153_v28 }
  0x9a   :  { %v150_v29 = vpop.f32.mrf.mxu0 }
  0x9b   :  { %v49_v29 = vld [vmem:[%s804_s1] sm:$0xff] }
  0x9c   :  { %v648_v34 = vadd.f32 -1.0, %v49_v29 }
  0x9e   :  { %v462_v36 = vmul.f32 100000.0, %v648_v34 }
 0x116   :  { %v248_v0 = vpop.f32.mrf.mxu1 }
 0x117   :  { %v249_v1 = vadd.f32 %v248_v0, %v155_v60 }
 0x119   :  { %v265_v3 = vmax.f32 %v249_v1, 0.0 }
 0x11b   :  { %v267_v5 = vpack.c.bf16 %v265_v3, %v265_v3 }
 0x11c   :  { %v261_v6 = vpop.f32.mrf.mxu2 }
 0x11d   :  { %v262_v7 = vadd.f32 %v261_v6, %v156_v4  ;;  %373 = vmatmul.bf16.vlgmr.msra.gmra.mxu3 %v267_v5 }
 0x11e   :  { %v250_v8 = vpop.f32.mrf.mxu1 }
 0x11f   :  { %v266_v9 = vmax.f32 %v262_v7, 0.0 }
 0x121   :  { %v268_v10 = vpack.c.bf16 %v266_v9, %v266_v9 }
 0x123   :  { %386 = vmatmul.bf16.vlgmr.msrb.gmra.mxu0 %v268_v10 }
 0x124   :  { %v263_v11 = vpop.f32.mrf.mxu2 }
 0x1a0   :  { %v374_v19 = vpop.f32.mrf.mxu3  ;;  %v387_v20 = vpop.f32.mrf.mxu0 }
 0x1a1   :  { %v375_v21 = vadd.f32 %v374_v19, %v121_v18 }
 0x1a3   :  { %v388_v22 = vadd.f32 %v387_v20, %v375_v21 }
 0x1a5   :  { %v391_v23 = vmax.f32 %v388_v22, 0.0 }
 0x1a7   :  { %v392_v24 = vpack.c.bf16 %v391_v23, %v391_v23 }
 0x1a8   :  { %v376_v25 = vpop.f32.mrf.mxu3  ;;  %v389_v26 = vpop.f32.mrf.mxu0 }
 0x1a9   :  { %449 = vmatmul.bf16.vlgmr.msrb.gmra.mxu1 %v392_v24 }
 0x226   :  { %v450_v28 = vpop.f32.mrf.mxu1 }
 0x227   :  { %v451_v30 = vadd.f32 %v450_v28, %v122_v27 }
 0x229   :  { %471 = vst.msk [vmem:[%s807_s4] sm:$0xff] %vm135_vm0, %v451_v30  ;;  %v454_v31 = vmul.f32 %v451_v30, %v49_v29 }
 0x22b   :  { %v456_v32 = vsel %vm455_vm1, %v454_v31, -inf }
 0x22c   :  { %457 = vmax.xlane.f32.xlu0 %v456_v32 }
 0x22e   :  { %v452_v33 = vpop.f32.mrf.mxu1 }
 0x29f   :  { %v458_v35 = vpop.xlane.xlu0 %457 }
 0x2a0   :  { %v459_v37 = vsub.f32 %v451_v30, %v458_v35 }
 0x2a2   :  { %v460_v38 = vmul.f32 %v459_v37, %v49_v29 }
 0x2a4   :  { %v463_v39 = vadd.f32 %v462_v36, %v460_v38 }
 0x2a6   :  { %v464_v40 = vmul.f32 1.442695, %v463_v39 }
 0x2a8   :  { %695 = vpow2.f32 %v464_v40 }
 0x2ae   :  { %v696_v41 = vpop.eup %695 }
 0x2af   :  { %v466_v42 = vsel %vm455_vm1, %v696_v41, 0.0 }
 0x2b0   :  { %467 = vadd.xlane.f32.xlu0 %v466_v42 }
 0x323   :  { %v468_v43 = vpop.xlane.xlu0 %467 }
 0x324   :  { %697 = vrcp.f32 %v468_v43 }
 0x32a   :  { %v698_v44 = vpop.eup %697 }
 0x32b   :  { %v470_v45 = vmul.f32 %v698_v44, %v696_v41 }
 0x32d   :  { %472 = vst.msk [vmem:[%s807_s4] sm:$0xff] %vm455_vm1, %v470_v45 }
 0x32e   :  { %477 = vsyncpa [#allocation3], 1 }
 0x32f   :  { %478 = vsyncpa [#allocation5], 1 }

// kernel: _forward_impl.1
= control target key start
LH: loop header
LB: loop body
LE: loop exit
PB: predicated region body
PF: predicated region fallthrough
CT: control target
= control target key end

     0   :  { %9 = vsyncpa [#allocation3], 0  ;;  %s803_s0 = inlined_call_operand.vmem [shape: bf16[8,32], index: 0, kind: input, shape index: {}]   ;;  %s804_s1 = inlined_call_operand.vmem [shape: f32[8,16], index: 1, kind: input, shape index: {}]   ;;  %s805_s2 = inlined_call_operand.hbm [shape: bf16[544,256], index: 2, kind: input, shape index: {}]   ;;  %s806_s3 = inlined_call_operand.hbm [shape: f32[8,256], index: 3, kind: input, shape index: {}]   ;;  %s807_s4 = inlined_call_operand.vmem [shape: f32[8,32], index: 4, kind: output, shape index: {}]  }
   0x1   :  { %s19_s17 = sshll.u32 %s805_s2, 4  ;;  %s20_s17 = int_to_ptr.hbm [resolvable:$true] %s19_s17 }
   0x2   :  { %10 = vsyncpa [#allocation5], 0  ;;  %s751_s18 = smov [#allocation2]   ;;  %s33_s22 = sshll.u32 %s806_s3, 4  ;;  %s34_s22 = int_to_ptr.hbm [resolvable:$true] %s33_s22 }
   0x3   :  { %s21_s19 = sshll.u32 %s751_s18, 4  ;;  %s752_s23 = smov 128   ;;  %s22_s19 = int_to_ptr.vmem [resolvable:$true] %s21_s19 }
   0x4   :  { %s753_s24 = smov 8   ;;  %s754_s25 = smov [#allocation4]  }
   0x5   :  { %27 = dma.hbm_to_vmem [thread:$0]  %s20_s17, 8704, %s22_s19, [#allocation3], %s752_s23, %s752_s23, %s753_s24  }
   0x6   :  { %s35_s26 = sshll.u32 %s754_s25, 4  ;;  %s36_s26 = int_to_ptr.vmem [resolvable:$true] %s35_s26 }
   0x7   :  { %38 = dma.hbm_to_vmem [thread:$0]  %s34_s22, 256, %s36_s26, [#allocation5]  }
   0x8   :  { %747 = dma.done.wait [#allocation3], 8704  }
   0x9   :  { %748 = vsyncadd [#allocation3], 4294958592 }
   0xa   :  { %749 = dma.done.wait [#allocation5], 256  }
   0xb   :  { %750 = vsyncadd [#allocation5], 4294967040  ;;  %v485_v0 = vld [vmem:[#allocation2 + $0x10] sm:$0xf]  ;;  %v650_v1 = vld [vmem:[#allocation2 + $0x14] sm:$0xf0] }
   0xc   :  { %v481_v2 = vld [vmem:[#allocation2] sm:$0xf]  ;;  %v486_v3 = vor.u32 %v650_v1, %v485_v0  ;;  %v649_v4 = vld [vmem:[#allocation2 + $0x4] sm:$0xf0]  ;;  %v546_v5 = vld [vmem:[#allocation2 + $0x90] sm:$0xf] }
   0xd   :  { %v666_v6 = vld [vmem:[#allocation2 + $0x94] sm:$0xf0]  ;;  %v665_v7 = vld [vmem:[#allocation2 + $0x94] sm:$0xf]  ;;  %v548_v8 = vld [vmem:[#allocation2 + $0x98] sm:$0xf0]  ;;  %v482_v9 = vor.u32 %v649_v4, %v481_v2 }
   0xe   :  { %145 = vmatpush.bf16.msra.mxu0 %v486_v3  ;;  %v547_v10 = vor.u32 %v666_v6, %v546_v5  ;;  %v551_v11 = vor.u32 %v665_v7, %v548_v8  ;;  %v538_v12 = vld [vmem:[#allocation2 + $0x80] sm:$0xf]  ;;  %v664_v13 = vld [vmem:[#allocation2 + $0x84] sm:$0xf0]  ;;  %v663_v14 = vld [vmem:[#allocation2 + $0x84] sm:$0xf] }
   0xf   :  { %v540_v15 = vld [vmem:[#allocation2 + $0x88] sm:$0xf0]  ;;  %v539_v16 = vor.u32 %v664_v13, %v538_v12  ;;  %v530_v18 = vld [vmem:[#allocation2 + $0x70] sm:$0xf]  ;;  %v662_v19 = vld [vmem:[#allocation2 + $0x74] sm:$0xf0] }
  0x10   :  { %239 = vmatpush.bf16.msra.mxu1 %v547_v10  ;;  %252 = vmatpush.bf16.msra.mxu2 %v551_v11  ;;  %v543_v17 = vor.u32 %v663_v14, %v540_v15  ;;  %v661_v20 = vld [vmem:[#allocation2 + $0x74] sm:$0xf]  ;;  %v532_v21 = vld [vmem:[#allocation2 + $0x78] sm:$0xf0]  ;;  %v48_v22 = vld [vmem:[%s803_s0] sm:$0xf]  ;;  %v531_v23 = vor.u32 %v662_v19, %v530_v18 }
  0x11   :  { %vm135_vm0 = vcmask 261120   ;;  %v535_v24 = vor.u32 %v661_v20, %v532_v21  ;;  %v522_v25 = vld [vmem:[#allocation2 + $0x60] sm:$0xf]  ;;  %v660_v26 = vld [vmem:[#allocation2 + $0x64] sm:$0xf0]  ;;  %vm455_vm1 = vcmask 130048  }
  0x12   :  { %146 = vmatpush.bf16.msra.mxu0 %v482_v9  ;;  %v659_v27 = vld [vmem:[#allocation2 + $0x64] sm:$0xf]  ;;  %v524_v28 = vld [vmem:[#allocation2 + $0x68] sm:$0xf0]  ;;  %v523_v29 = vor.u32 %v660_v26, %v522_v25  ;;  %v514_v31 = vld [vmem:[#allocation2 + $0x50] sm:$0xf] }
  0x13   :  { %v527_v30 = vor.u32 %v659_v27, %v524_v28  ;;  %v658_v32 = vld [vmem:[#allocation2 + $0x54] sm:$0xf0]  ;;  %v657_v33 = vld [vmem:[#allocation2 + $0x54] sm:$0xf]  ;;  %v516_v34 = vld [vmem:[#allocation2 + $0x58] sm:$0xf0] }
  0x14   :  { %240 = vmatpush.bf16.msra.mxu1 %v539_v16  ;;  %253 = vmatpush.bf16.msra.mxu2 %v543_v17  ;;  %v515_v35 = vor.u32 %v658_v32, %v514_v31  ;;  %v519_v36 = vor.u32 %v657_v33, %v516_v34  ;;  %v506_v37 = vld [vmem:[#allocation2 + $0x40] sm:$0xf]  ;;  %v656_v38 = vld [vmem:[#allocation2 + $0x44] sm:$0xf0]  ;;  %v655_v39 = vld [vmem:[#allocation2 + $0x44] sm:$0xf] }
  0x15   :  { %487 = vmatmul.msk.bf16.vlgmr.msra.gmra.mxu0 %vm135_vm0, %v48_v22  ;;  %v508_v40 = vld [vmem:[#allocation2 + $0x48] sm:$0xf0]  ;;  %v507_v41 = vor.u32 %v656_v38, %v506_v37  ;;  %v498_v43 = vld [vmem:[#allocation2 + $0x30] sm:$0xf]  ;;  %v654_v44 = vld [vmem:[#allocation2 + $0x34] sm:$0xf0] }
  0x16   :  { %v511_v42 = vor.u32 %v655_v39, %v508_v40  ;;  %v653_v45 = vld [vmem:[#allocation2 + $0x34] sm:$0xf]  ;;  %v499_v46 = vor.u32 %v654_v44, %v498_v43  ;;  %v500_v47 = vld [vmem:[#allocation2 + $0x38] sm:$0xf0]  ;;  %v490_v49 = vld [vmem:[#allocation2 + $0x20] sm:$0xf] }
  0x17   :  { %v503_v48 = vor.u32 %v653_v45, %v500_v47  ;;  %v652_v50 = vld [vmem:[#allocation2 + $0x24] sm:$0xf0]  ;;  %v651_v51 = vld [vmem:[#allocation2 + $0x24] sm:$0xf]  ;;  %v492_v53 = vld [vmem:[#allocation2 + $0x28] sm:$0xf0] }
  0x18   :  { %241 = vmatpush.bf16.msra.mxu1 %v531_v23  ;;  %254 = vmatpush.bf16.msra.mxu2 %v535_v24  ;;  %v491_v52 = vor.u32 %v652_v50, %v490_v49  ;;  %v495_v54 = vor.u32 %v651_v51, %v492_v53  ;;  %v582_v55 = vld [vmem:[#allocation2 + $0x110] sm:$0xf]  ;;  %v674_v56 = vld [vmem:[#allocation2 + $0x114] sm:$0xf0]  ;;  %v578_v57 = vld [vmem:[#allocation2 + $0x100] sm:$0xf] }
  0x19   :  { %v583_v58 = vor.u32 %v674_v56, %v582_v55  ;;  %v673_v59 = vld [vmem:[#allocation2 + $0x104] sm:$0xf0]  ;;  %v614_v60 = vld [vmem:[#allocation2 + $0x190] sm:$0xf]  ;;  %v682_v61 = vld [vmem:[#allocation2 + $0x194] sm:$0xf0] }
  0x1a   :  { %v615_v62 = vor.u32 %v682_v61, %v614_v60  ;;  %v610_v63 = vld [vmem:[#allocation2 + $0x180] sm:$0xf]  ;;  %v579_v0 = vor.u32 %v673_v59, %v578_v57  ;;  %v681_v1 = vld [vmem:[#allocation2 + $0x184] sm:$0xf0]  ;;  %v574_v2 = vld [vmem:[#allocation2 + $0xf0] sm:$0xf] }
  0x1b   :  { %365 = vmatpush.bf16.msra.mxu3 %v583_v58  ;;  %v672_v3 = vld [vmem:[#allocation2 + $0xf4] sm:$0xf0]  ;;  %v611_v4 = vor.u32 %v681_v1, %v610_v63  ;;  %v606_v5 = vld [vmem:[#allocation2 + $0x170] sm:$0xf]  ;;  %v570_v8 = vld [vmem:[#allocation2 + $0xe0] sm:$0xf] }
  0x1c   :  { %242 = vmatpush.bf16.msra.mxu1 %v523_v29  ;;  %255 = vmatpush.bf16.msra.mxu2 %v527_v30  ;;  %v680_v6 = vld [vmem:[#allocation2 + $0x174] sm:$0xf0]  ;;  %v575_v7 = vor.u32 %v672_v3, %v574_v2  ;;  %v671_v9 = vld [vmem:[#allocation2 + $0xe4] sm:$0xf0]  ;;  %v602_v11 = vld [vmem:[#allocation2 + $0x160] sm:$0xf] }
  0x1d   :  { %378 = vmatpush.bf16.msrb.mxu0 %v615_v62  ;;  %v607_v10 = vor.u32 %v680_v6, %v606_v5  ;;  %v679_v12 = vld [vmem:[#allocation2 + $0x164] sm:$0xf0]  ;;  %v571_v13 = vor.u32 %v671_v9, %v570_v8  ;;  %v566_v14 = vld [vmem:[#allocation2 + $0xd0] sm:$0xf]  ;;  %v670_v15 = vld [vmem:[#allocation2 + $0xd4] sm:$0xf0] }
  0x1e   :  { %v603_v16 = vor.u32 %v679_v12, %v602_v11  ;;  %v598_v17 = vld [vmem:[#allocation2 + $0x150] sm:$0xf]  ;;  %v678_v18 = vld [vmem:[#allocation2 + $0x154] sm:$0xf0]  ;;  %v567_v19 = vor.u32 %v670_v15, %v566_v14  ;;  %v562_v20 = vld [vmem:[#allocation2 + $0xc0] sm:$0xf] }
  0x1f   :  { %366 = vmatpush.bf16.msra.mxu3 %v579_v0  ;;  %v669_v21 = vld [vmem:[#allocation2 + $0xc4] sm:$0xf0]  ;;  %v599_v22 = vor.u32 %v678_v18, %v598_v17  ;;  %v118_v24 = vld [vmem:[#allocation4] ss:$0 sm:$0xff]  ;;  %v558_v30 = vld [vmem:[#allocation2 + $0xb0] sm:$0xf] }
  0x20   :  { %243 = vmatpush.bf16.msra.mxu1 %v515_v35  ;;  %256 = vmatpush.bf16.msra.mxu2 %v519_v36  ;;  %v563_v23 = vor.u32 %v669_v21, %v562_v20  ;;  %v668_v31 = vld [vmem:[#allocation2 + $0xb4] sm:$0xf0]  ;;  %v594_v33 = vld [vmem:[#allocation2 + $0x140] sm:$0xf]  ;;  %v677_v34 = vld [vmem:[#allocation2 + $0x144] sm:$0xf0] }
  0x21   :  { %379 = vmatpush.bf16.msrb.mxu0 %v611_v4  ;;  %v559_v32 = vor.u32 %v668_v31, %v558_v30  ;;  %v595_v35 = vor.u32 %v677_v34, %v594_v33  ;;  %v554_v36 = vld [vmem:[#allocation2 + $0xa0] sm:$0xf]  ;;  %v667_v37 = vld [vmem:[#allocation2 + $0xa4] sm:$0xf0]  ;;  %v590_v39 = vld [vmem:[#allocation2 + $0x130] sm:$0xf] }
  0x22   :  { %v555_v38 = vor.u32 %v667_v37, %v554_v36  ;;  %v676_v40 = vld [vmem:[#allocation2 + $0x134] sm:$0xf0]  ;;  %v675_v43 = vld [vmem:[#allocation2 + $0x124] sm:$0xf0]  ;;  %v646_v45 = vld [vmem:[#allocation2 + $0x210] sm:$0xf] }
  0x23   :  { %367 = vmatpush.bf16.msra.mxu3 %v575_v7  ;;  %v642_v47 = vld [vmem:[#allocation2 + $0x200] sm:$0xf]  ;;  %v689_v49 = vld [vmem:[#allocation2 + $0x204] sm:$0xf0]  ;;  %v638_v51 = vld [vmem:[#allocation2 + $0x1f0] sm:$0xf] }
  0x24   :  { %244 = vmatpush.bf16.msra.mxu1 %v507_v41  ;;  %257 = vmatpush.bf16.msra.mxu2 %v511_v42  ;;  %v591_v41 = vor.u32 %v676_v40, %v590_v39  ;;  %v586_v42 = vld [vmem:[#allocation2 + $0x120] sm:$0xf]  ;;  %v643_v50 = vor.u32 %v689_v49, %v642_v47  ;;  %v687_v55 = vld [vmem:[#allocation2 + $0x1e4] sm:$0xf0]  ;;  %v630_v58 = vld [vmem:[#allocation2 + $0x1d0] sm:$0xf] }
  0x25   :  { %380 = vmatpush.bf16.msrb.mxu0 %v607_v10  ;;  %v587_v44 = vor.u32 %v675_v43, %v586_v42  ;;  %v120_v56 = vld [vmem:[#allocation4 + $0x1] ss:$8 sm:$0x3]  ;;  %v686_v59 = vld [vmem:[#allocation2 + $0x1d4] sm:$0xf0] }
  0x26   :  { %v155_v60 = vperm.slane %v120_v56, 0  ;;  %v631_v61 = vor.u32 %v686_v59, %v630_v58  ;;  %v626_v62 = vld [vmem:[#allocation2 + $0x1c0] sm:$0xf]  ;;  %v685_v63 = vld [vmem:[#allocation2 + $0x1c4] sm:$0xf0]  ;;  %v156_v4 = vperm.slane %v120_v56, 1 }
  0x27   :  { %368 = vmatpush.bf16.msra.mxu3 %v571_v13  ;;  %v627_v2 = vor.u32 %v685_v63, %v626_v62  ;;  %v622_v12 = vld [vmem:[#allocation2 + $0x1b0] sm:$0xf]  ;;  %v684_v13 = vld [vmem:[#allocation2 + $0x1b4] sm:$0xf0]  ;;  %v618_v15 = vld [vmem:[#allocation2 + $0x1a0] sm:$0xf] }
  0x28   :  { %245 = vmatpush.bf16.msra.mxu1 %v499_v46  ;;  %258 = vmatpush.bf16.msra.mxu2 %v503_v48  ;;  %v690_v46 = vld [vmem:[#allocation2 + $0x214] sm:$0xf0]  ;;  %v623_v14 = vor.u32 %v684_v13, %v622_v12  ;;  %v121_v18 = vld [vmem:[#allocation4 + $0x2] ss:$0 sm:$0xff] }
  0x29   :  { %381 = vmatpush.bf16.msrb.mxu0 %v603_v16  ;;  %v647_v48 = vor.u32 %v690_v46, %v646_v45  ;;  %v683_v16 = vld [vmem:[#allocation2 + $0x1a4] sm:$0xf0] }
  0x2a   :  { %v619_v17 = vor.u32 %v683_v16, %v618_v15 }
  0x2b   :  { %369 = vmatpush.bf16.msra.mxu3 %v567_v19 }
  0x2c   :  { %246 = vmatpush.bf16.msra.mxu1 %v491_v52  ;;  %259 = vmatpush.bf16.msra.mxu2 %v495_v54  ;;  %v688_v52 = vld [vmem:[#allocation2 + $0x1f4] sm:$0xf0]  ;;  %v634_v54 = vld [vmem:[#allocation2 + $0x1e0] sm:$0xf] }
  0x2d   :  { %382 = vmatpush.bf16.msrb.mxu0 %v599_v22  ;;  %v639_v53 = vor.u32 %v688_v52, %v638_v51  ;;  %v635_v57 = vor.u32 %v687_v55, %v634_v54 }
  0x2f   :  { %370 = vmatpush.bf16.msra.mxu3 %v563_v23 }
  0x30   :  { %441 = vmatpush.bf16.msrb.mxu1 %v647_v48 }
  0x31   :  { %383 = vmatpush.bf16.msrb.mxu0 %v595_v35 }
  0x33   :  { %371 = vmatpush.bf16.msra.mxu3 %v559_v32 }
  0x34   :  { %442 = vmatpush.bf16.msrb.mxu1 %v643_v50 }
  0x35   :  { %384 = vmatpush.bf16.msrb.mxu0 %v591_v41 }
  0x37   :  { %372 = vmatpush.bf16.msra.mxu3 %v555_v38 }
  0x38   :  { %443 = vmatpush.bf16.msrb.mxu1 %v639_v53 }
  0x39   :  { %385 = vmatpush.bf16.msrb.mxu0 %v587_v44 }
  0x3c   :  { %444 = vmatpush.bf16.msrb.mxu1 %v635_v57 }
  0x40   :  { %445 = vmatpush.bf16.msrb.mxu1 %v631_v61 }
  0x44   :  { %446 = vmatpush.bf16.msrb.mxu1 %v627_v2 }
  0x48   :  { %447 = vmatpush.bf16.msrb.mxu1 %v623_v14 }
  0x4c   :  { %448 = vmatpush.bf16.msrb.mxu1 %v619_v17 }
  0x92   :  { %v148_v25 = vpop.f32.mrf.mxu0 }
  0x93   :  { %v149_v26 = vadd.f32 %v148_v25, %v118_v24 }
  0x95   :  { %v152_v27 = vmax.f32 %v149_v26, 0.0 }
  0x97   :  { %v153_v28 = vpack.c.bf16 %v152_v27, %v152_v27  ;;  %v122_v27 = vld [vmem:[#allocation4 + $0x3] ss:$0 sm:$0xff] }
  0x99   :  { %247 = vmatmul.bf16.vlgmr.msra.gmra.mxu1 %v153_v28  ;;  %260 = vmatmul.bf16.vlgmr.msra.gmra.mxu2 %v153_v28 }
  0x9a   :  { %v150_v29 = vpop.f32.mrf.mxu0 }
  0x9b   :  { %v49_v29 = vld [vmem:[%s804_s1] sm:$0xff] }
  0x9c   :  { %v648_v34 = vadd.f32 -1.0, %v49_v29 }
  0x9e   :  { %v462_v36 = vmul.f32 100000.0, %v648_v34 }
 0x116   :  { %v248_v0 = vpop.f32.mrf.mxu1 }
 0x117   :  { %v249_v1 = vadd.f32 %v248_v0, %v155_v60 }
 0x119   :  { %v265_v3 = vmax.f32 %v249_v1, 0.0 }
 0x11b   :  { %v267_v5 = vpack.c.bf16 %v265_v3, %v265_v3 }
 0x11c   :  { %v261_v6 = vpop.f32.mrf.mxu2 }
 0x11d   :  { %v262_v7 = vadd.f32 %v261_v6, %v156_v4  ;;  %373 = vmatmul.bf16.vlgmr.msra.gmra.mxu3 %v267_v5 }
 0x11e   :  { %v250_v8 = vpop.f32.mrf.mxu1 }
 0x11f   :  { %v266_v9 = vmax.f32 %v262_v7, 0.0 }
 0x121   :  { %v268_v10 = vpack.c.bf16 %v266_v9, %v266_v9 }
 0x123   :  { %386 = vmatmul.bf16.vlgmr.msrb.gmra.mxu0 %v268_v10 }
 0x124   :  { %v263_v11 = vpop.f32.mrf.mxu2 }
 0x1a0   :  { %v374_v19 = vpop.f32.mrf.mxu3  ;;  %v387_v20 = vpop.f32.mrf.mxu0 }
 0x1a1   :  { %v375_v21 = vadd.f32 %v374_v19, %v121_v18 }
 0x1a3   :  { %v388_v22 = vadd.f32 %v387_v20, %v375_v21 }
 0x1a5   :  { %v391_v23 = vmax.f32 %v388_v22, 0.0 }
 0x1a7   :  { %v392_v24 = vpack.c.bf16 %v391_v23, %v391_v23 }
 0x1a8   :  { %v376_v25 = vpop.f32.mrf.mxu3  ;;  %v389_v26 = vpop.f32.mrf.mxu0 }
 0x1a9   :  { %449 = vmatmul.bf16.vlgmr.msrb.gmra.mxu1 %v392_v24 }
 0x226   :  { %v450_v28 = vpop.f32.mrf.mxu1 }
 0x227   :  { %v451_v30 = vadd.f32 %v450_v28, %v122_v27 }
 0x229   :  { %471 = vst.msk [vmem:[%s807_s4] sm:$0xff] %vm135_vm0, %v451_v30  ;;  %v454_v31 = vmul.f32 %v451_v30, %v49_v29 }
 0x22b   :  { %v456_v32 = vsel %vm455_vm1, %v454_v31, -inf }
 0x22c   :  { %457 = vmax.xlane.f32.xlu0 %v456_v32 }
 0x22e   :  { %v452_v33 = vpop.f32.mrf.mxu1 }
 0x29f   :  { %v458_v35 = vpop.xlane.xlu0 %457 }
 0x2a0   :  { %v459_v37 = vsub.f32 %v451_v30, %v458_v35 }
 0x2a2   :  { %v460_v38 = vmul.f32 %v459_v37, %v49_v29 }
 0x2a4   :  { %v463_v39 = vadd.f32 %v462_v36, %v460_v38 }
 0x2a6   :  { %v464_v40 = vmul.f32 1.442695, %v463_v39 }
 0x2a8   :  { %695 = vpow2.f32 %v464_v40 }
 0x2ae   :  { %v696_v41 = vpop.eup %695 }
 0x2af   :  { %v466_v42 = vsel %vm455_vm1, %v696_v41, 0.0 }
 0x2b0   :  { %467 = vadd.xlane.f32.xlu0 %v466_v42 }
 0x323   :  { %v468_v43 = vpop.xlane.xlu0 %467 }
 0x324   :  { %697 = vrcp.f32 %v468_v43 }
 0x32a   :  { %v698_v44 = vpop.eup %697 }
 0x32b   :  { %v470_v45 = vmul.f32 %v698_v44, %v696_v41 }
 0x32d   :  { %472 = vst.msk [vmem:[%s807_s4] sm:$0xff] %vm455_vm1, %v470_v45 }
 0x32e   :  { %477 = vsyncpa [#allocation3], 1 }
 0x32f   :  { %478 = vsyncpa [#allocation5], 1 }

</bundles_post_ra>
